<compile_context>
chip_gen: v7x
topology: tpu7x:2x2x1
jax: 0.10.0
libtpu: 0.0.40
codegen_flags: <defaults>
</compile_context>

<pallas_src>
import jax
import jax.numpy as jnp
from jax.experimental import pallas as pl
from jax.experimental.pallas import tpu as pltpu

HIDDEN = 64
WIDTH = 2 * HIDDEN  # 128 lanes: actor half [0:64], critic half [64:128]


def make_a2c_kernel(input_size, output_size):
    # Static row offsets into the packed parameter slab.
    w1_off = 0
    w2_off = input_size
    w3_off = input_size + WIDTH
    b_off = input_size + 2 * WIDTH  # 3 bias rows (+ zero padding to 8 rows)

    def kernel(x_ref, p_ref, out_ref):
        x = x_ref[...]                                           # (batch, in)

        w1 = p_ref[w1_off:w1_off + input_size, :]                # (in, 128)
        w2 = p_ref[w2_off:w2_off + WIDTH, :]                     # (128, 128)
        w3 = p_ref[w3_off:w3_off + WIDTH, :]                     # (128, 128)
        b1 = p_ref[b_off + 0:b_off + 1, :]                       # (1, 128)
        b2 = p_ref[b_off + 1:b_off + 2, :]
        b3 = p_ref[b_off + 2:b_off + 3, :]

        # Fused actor+critic MLP: 3 lane-dense matmuls, f32 accumulation.
        h = jnp.maximum(jnp.dot(x, w1, preferred_element_type=jnp.float32) + b1, 0.0)
        h = jnp.maximum(jnp.dot(h, w2, preferred_element_type=jnp.float32) + b2, 0.0)
        z = jnp.dot(h, w3, preferred_element_type=jnp.float32) + b3   # (batch, 128)

        # Per-lane softmax over the batch axis (dim=0), matching F.softmax(x, dim=0).
        m = jnp.max(z, axis=0, keepdims=True)
        e = jnp.exp(z - m)
        inv = pl.reciprocal(jnp.sum(e, axis=0, keepdims=True), approx=False)
        probs = e * inv

        # Lane-dense combined output: actor probs in lanes [0:output_size],
        # raw critic value in lane output_size; remaining lanes are don't-care.
        lane = jax.lax.broadcasted_iota(jnp.int32, z.shape, 1)
        out_ref[...] = jnp.where(lane < output_size, probs, z)

    return kernel


def pack_params(p, input_size, output_size):
    """Pack all 12 parameter tensors into one (in + 2*128 + 8, 128) f32 slab."""
    w1 = jnp.concatenate([p["aw1"], p["cw1"]], axis=1)                      # (in, 128)

    w2 = jnp.zeros((WIDTH, WIDTH), jnp.float32)
    w2 = w2.at[:HIDDEN, :HIDDEN].set(p["aw2"])
    w2 = w2.at[HIDDEN:, HIDDEN:].set(p["cw2"])                              # (128, 128)

    w3 = jnp.zeros((WIDTH, WIDTH), jnp.float32)
    w3 = w3.at[:HIDDEN, :output_size].set(p["aw3"])
    w3 = w3.at[HIDDEN:, output_size:output_size + 1].set(p["cw3"])          # (128, 128)

    b1 = jnp.concatenate([p["ab1"], p["cb1"]], axis=1)                      # (1, 128)
    b2 = jnp.concatenate([p["ab2"], p["cb2"]], axis=1)
    b3 = jnp.zeros((1, WIDTH), jnp.float32)
    b3 = b3.at[:, :output_size].set(p["ab3"])
    b3 = b3.at[:, output_size:output_size + 1].set(p["cb3"])
    bias_rows = jnp.concatenate(
        [b1, b2, b3, jnp.zeros((5, WIDTH), jnp.float32)], axis=0)           # (8, 128)

    return jnp.concatenate([w1, w2, w3, bias_rows], axis=0)                 # (in+264, 128)


def simple_a2c_forward(x, packed, input_size, output_size):
    batch = x.shape[0]
    vmem = pl.BlockSpec(memory_space=pltpu.MemorySpace.VMEM)
    out = pl.pallas_call(
        make_a2c_kernel(input_size, output_size),
        out_shape=jax.ShapeDtypeStruct((batch, WIDTH), jnp.float32),
        in_specs=[vmem, vmem],
        out_specs=vmem,
    )(x, packed)
    actor = out[:, :output_size]
    critic = out[:, output_size:output_size + 1]
    return actor, critic


def init_params(key, input_size, output_size):
    # Deterministic synthetic parameters (shapes match the PyTorch module).
    ks = jax.random.split(key, 12)

    def lin(kw, kb, fan_in, fan_out):
        scale = 1.0 / jnp.sqrt(jnp.float32(fan_in))
        w = jax.random.uniform(kw, (fan_in, fan_out), jnp.float32, -scale, scale)
        b = jax.random.uniform(kb, (1, fan_out), jnp.float32, -scale, scale)
        return w, b

    aw1, ab1 = lin(ks[0], ks[1], input_size, HIDDEN)
    aw2, ab2 = lin(ks[2], ks[3], HIDDEN, HIDDEN)
    aw3, ab3 = lin(ks[4], ks[5], HIDDEN, output_size)
    cw1, cb1 = lin(ks[6], ks[7], input_size, HIDDEN)
    cw2, cb2 = lin(ks[8], ks[9], HIDDEN, HIDDEN)
    cw3, cb3 = lin(ks[10], ks[11], HIDDEN, 1)
    return dict(aw1=aw1, ab1=ab1, aw2=aw2, ab2=ab2, aw3=aw3, ab3=ab3,
                cw1=cw1, cb1=cb1, cw2=cw2, cb2=cb2, cw3=cw3, cb3=cb3)


def reference_forward(x, p):
    def mlp(x, w1, b1, w2, b2, w3, b3):
        h = jnp.maximum(x @ w1 + b1, 0.0)
        h = jnp.maximum(h @ w2 + b2, 0.0)
        return h @ w3 + b3

    logits = mlp(x, p["aw1"], p["ab1"], p["aw2"], p["ab2"], p["aw3"], p["ab3"])
    actor = jax.nn.softmax(logits, axis=0)
    critic = mlp(x, p["cw1"], p["cb1"], p["cw2"], p["cb2"], p["cw3"], p["cb3"])
    return actor, critic


if __name__ == "__main__":
    batch, input_size, output_size = 8, 32, 4
    key = jax.random.PRNGKey(0)
    kx, kp = jax.random.split(key)
    x = jax.random.normal(kx, (batch, input_size), jnp.float32)
    params = init_params(kp, input_size, output_size)
    packed = pack_params(params, input_size, output_size)   # packed once, reused per call

    actor, critic = simple_a2c_forward(x, packed, input_size, output_size)
    jax.block_until_ready((actor, critic))

    ref_actor, ref_critic = reference_forward(x, params)
    assert actor.shape == (batch, output_size) and critic.shape == (batch, 1)
    assert jnp.allclose(actor, ref_actor, atol=1e-5, rtol=1e-5)
    assert jnp.allclose(critic, ref_critic, atol=1e-5, rtol=1e-5)
    print("KERNEL_OK")
</pallas_src>

<mosaic_0001>
module attributes {stable_mosaic.version = 11 : i64} {
  func.func @kernel(%arg0: memref<8x32xf32, #tpu.memory_space<vmem>>, %arg1: memref<296x128xf32, #tpu.memory_space<vmem>>, %arg2: memref<8x128xf32, #tpu.memory_space<vmem>>) attributes {dimension_semantics = [], scalar_prefetch = 0 : i64, scratch_operands = 0 : i64, tpu.core_type = #tpu.core_type<tc>} {
    %c0 = arith.constant 0 : index
    %c0_0 = arith.constant 0 : index
    %0 = vector.load %arg0[%c0, %c0_0] : memref<8x32xf32, #tpu.memory_space<vmem>>, vector<8x32xf32>
    %c0_1 = arith.constant 0 : index
    %c0_2 = arith.constant 0 : index
    %1 = vector.load %arg1[%c0_1, %c0_2] : memref<296x128xf32, #tpu.memory_space<vmem>>, vector<32x128xf32>
    %c32 = arith.constant 32 : index
    %c0_3 = arith.constant 0 : index
    %2 = vector.load %arg1[%c32, %c0_3] : memref<296x128xf32, #tpu.memory_space<vmem>>, vector<128x128xf32>
    %c160 = arith.constant 160 : index
    %c0_4 = arith.constant 0 : index
    %3 = vector.load %arg1[%c160, %c0_4] : memref<296x128xf32, #tpu.memory_space<vmem>>, vector<128x128xf32>
    %c288 = arith.constant 288 : index
    %c0_5 = arith.constant 0 : index
    %4 = vector.load %arg1[%c288, %c0_5] : memref<296x128xf32, #tpu.memory_space<vmem>>, vector<1x128xf32>
    %c289 = arith.constant 289 : index
    %c0_6 = arith.constant 0 : index
    %5 = vector.load %arg1[%c289, %c0_6] : memref<296x128xf32, #tpu.memory_space<vmem>>, vector<1x128xf32>
    %c290 = arith.constant 290 : index
    %c0_7 = arith.constant 0 : index
    %6 = vector.load %arg1[%c290, %c0_7] : memref<296x128xf32, #tpu.memory_space<vmem>>, vector<1x128xf32>
    %cst = arith.constant dense<0.000000e+00> : vector<8x128xf32>
    %7 = tpu.matmul %0, %1, %cst {dimension_numbers = #tpu.dot_dimension_numbers<[1], [0], [0], [1], [0, 0, 1, 1], [], []>} : vector<8x32xf32>, vector<32x128xf32>, vector<8x128xf32> -> vector<8x128xf32>
    %8 = vector.broadcast %4 : vector<1x128xf32> to vector<8x128xf32>
    %9 = arith.addf %7, %8 : vector<8x128xf32>
    %cst_8 = arith.constant 0.000000e+00 : f32
    %10 = vector.broadcast %cst_8 : f32 to vector<8x128xf32>
    %11 = arith.maximumf %9, %10 : vector<8x128xf32>
    %cst_9 = arith.constant dense<0.000000e+00> : vector<8x128xf32>
    %12 = tpu.matmul %11, %2, %cst_9 {dimension_numbers = #tpu.dot_dimension_numbers<[1], [0], [0], [1], [0, 0, 1, 1], [], []>} : vector<8x128xf32>, vector<128x128xf32>, vector<8x128xf32> -> vector<8x128xf32>
    %13 = vector.broadcast %5 : vector<1x128xf32> to vector<8x128xf32>
    %14 = arith.addf %12, %13 : vector<8x128xf32>
    %cst_10 = arith.constant 0.000000e+00 : f32
    %15 = vector.broadcast %cst_10 : f32 to vector<8x128xf32>
    %16 = arith.maximumf %14, %15 : vector<8x128xf32>
    %cst_11 = arith.constant dense<0.000000e+00> : vector<8x128xf32>
    %17 = tpu.matmul %16, %3, %cst_11 {dimension_numbers = #tpu.dot_dimension_numbers<[1], [0], [0], [1], [0, 0, 1, 1], [], []>} : vector<8x128xf32>, vector<128x128xf32>, vector<8x128xf32> -> vector<8x128xf32>
    %18 = vector.broadcast %6 : vector<1x128xf32> to vector<8x128xf32>
    %19 = arith.addf %17, %18 : vector<8x128xf32>
    %cst_12 = arith.constant dense<0xFF800000> : vector<128xf32>
    %20 = vector.multi_reduction <maximumf>, %19, %cst_12 [0] : vector<8x128xf32> to vector<128xf32>
    %21 = vector.shape_cast %20 : vector<128xf32> to vector<1x128xf32>
    %22 = vector.broadcast %21 : vector<1x128xf32> to vector<8x128xf32>
    %23 = arith.subf %19, %22 : vector<8x128xf32>
    %24 = math.exp %23 : vector<8x128xf32>
    %cst_13 = arith.constant dense<0.000000e+00> : vector<128xf32>
    %25 = vector.multi_reduction <add>, %24, %cst_13 [0] : vector<8x128xf32> to vector<128xf32>
    %26 = vector.shape_cast %25 : vector<128xf32> to vector<1x128xf32>
    %27 = tpu.reciprocal %26 : vector<1x128xf32> -> vector<1x128xf32>
    %28 = vector.broadcast %27 : vector<1x128xf32> to vector<8x128xf32>
    %29 = arith.mulf %24, %28 : vector<8x128xf32>
    %30 = tpu.iota {dimensions = array<i32: 1>} : vector<8x128xi32>
    %c4_i32 = arith.constant 4 : i32
    %31 = vector.broadcast %c4_i32 : i32 to vector<8x128xi32>
    %32 = arith.cmpi slt, %30, %31 : vector<8x128xi32>
    %33 = arith.select %32, %29, %19 : vector<8x128xi1>, vector<8x128xf32>
    %c0_14 = arith.constant 0 : index
    %c0_15 = arith.constant 0 : index
    %34 = vector.load %arg2[%c0_14, %c0_15] : memref<8x128xf32, #tpu.memory_space<vmem>>, vector<8x128xf32>
    tpu.vector_store %arg2[%c0_14, %c0_15], %33 {strides = array<i32>} : memref<8x128xf32, #tpu.memory_space<vmem>>, vector<8x128xf32>,
    return
  }
}

</mosaic_0001>

<bundles_post_ra>
// kernel: tpu_custom_call.1
= control target key start
LH: loop header
LB: loop body
LE: loop exit
PB: predicated region body
PF: predicated region fallthrough
CT: control target
= control target key end

     0   :  { %7 = vsyncpa [#allocation3], 0  ;;  %s693_s0 = inlined_call_operand.hbm [shape: f32[8,32], index: 0, kind: input, shape index: {}]   ;;  %s694_s1 = inlined_call_operand.hbm [shape: f32[296,128], index: 1, kind: input, shape index: {}]   ;;  %s695_s2 = inlined_call_operand.hbm [shape: f32[8,128], index: 2, kind: output, shape index: {}]  }
   0x1   :  { %8 = vsyncpa [#allocation6], 0 }
   0x2   :  { %9 = vsyncpa [#allocation4], 0  ;;  %s606_s9 = smov [#allocation2]   ;;  %s607_s11 = smov [#allocation5]  }
   0x3   :  { %s16_s10 = sshll.u32 %s606_s9, 4  ;;  %s25_s12 = sshll.u32 %s607_s11, 4  ;;  %s17_s10 = int_to_ptr.vmem [resolvable:$true] %s16_s10  ;;  %s629_s12 = int_to_ptr.vmem [resolvable:$true] %s25_s12 }
   0x4   :  { %s534_s15 = scalar_lea.hbm %s693_s0, 128 }
   0x5   :  { %p535_p0 = scmp.ne.s32.totalorder %s693_s0, %s534_s15  ;;  %p538_p1 = scmp.lt.u32.totalorder %s534_s15, %s693_s0 }
   0x7   :  { %p540_p2 = pnand %p538_p1, %p535_p0 }
   0x9   :  { %543 = shalt.err (!%p540_p2)
}
   0xa   :  { %s544_s20 = scalar_lea.vmem %s17_s10, 128  ;;  %p549_p4 = scmp.lt.s32.totalorder %s17_s10, %s17_s10 }
   0xb   :  { %p545_p3 = scmp.ne.s32.totalorder %s17_s10, %s544_s20  ;;  %p550_p5 = scmp.lt.s32.totalorder %s544_s20, %s544_s20 }
   0xd   :  { %p551_p6 = por %p550_p5, %p549_p4 }
   0xf   :  { %p552_p7 = pnand %p551_p6, %p545_p3 }
  0x11   :  { %555 = shalt.err (!%p552_p7)
}
  0x12   :  { %19 = dma.hbm_to_vmem [thread:$0]  %s693_s0, 128, %s17_s10, [#allocation3]  }
  0x13   :  { %s556_s25 = scalar_lea.hbm %s694_s1, 4736 }
  0x14   :  { %p557_p8 = scmp.ne.s32.totalorder %s694_s1, %s556_s25  ;;  %p560_p9 = scmp.lt.u32.totalorder %s556_s25, %s694_s1 }
  0x16   :  { %p562_p10 = pnand %p560_p9, %p557_p8 }
  0x18   :  { %565 = shalt.err (!%p562_p10)
}
  0x19   :  { %s566_s30 = scalar_lea.vmem %s629_s12, 4736  ;;  %p571_p12 = scmp.lt.s32.totalorder %s629_s12, %s629_s12 }
  0x1a   :  { %p567_p11 = scmp.ne.s32.totalorder %s629_s12, %s566_s30  ;;  %p572_p13 = scmp.lt.s32.totalorder %s566_s30, %s566_s30 }
  0x1c   :  { %p573_p0 = por %p572_p13, %p571_p12 }
  0x1e   :  { %p574_p1 = pnand %p573_p0, %p567_p11 }
  0x20   :  { %577 = shalt.err (!%p574_p1)
}
  0x21   :  { %s608_s0 = smov 128   ;;  %s609_s3 = smov 8  }
  0x22   :  { %31 = dma.hbm_to_vmem [thread:$0]  %s694_s1, 4736, %s629_s12, [#allocation6], %s608_s0, %s608_s0, %s609_s3  }
  0x23   :  { %600 = dma.done.wait [#allocation3], 128  }
  0x24   :  { %601 = vsyncadd [#allocation3], 4294967168 }
  0x25   :  { %602 = dma.done.wait [#allocation6], 4736  }
  0x26   :  { %603 = vsyncadd [#allocation6], 4294962560  ;;  %v610_v0 = vmov 0.0|0.0   ;;  %vm611_vm0 = vmmov 0   ;;  %v612_v1 = vmov 0.0   ;;  %v39_v2 = vld [vmem:[#allocation5] sm:$0xff] }
  0x27   :  { %468 = vmatprep.subr.bf16.mxu0 %v610_v0  ;;  %395 = vmatprep.mubr.msk.f32.mxu0 %vm611_vm0, %v612_v1  ;;  %v40_v3 = vld [vmem:[#allocation5 + $0x8] sm:$0xff]  ;;  %v41_v4 = vld [vmem:[#allocation5 + $0x10] sm:$0xff]  ;;  %v42_v6 = vld [vmem:[#allocation5 + $0x18] sm:$0xff]  ;;  %vm82_vm1 = vcmask 261120   ;;  %s613_s1 = smov [#allocation7]  }
  0x28   :  { %474 = vmatprep.subr.bf16.mxu1 %v610_v0  ;;  %430 = vmatprep.mubr.msk.f32.mxu1 %vm611_vm0, %v612_v1  ;;  %v469_v5 = vpack.c.bf16 %v40_v3, %v39_v2  ;;  %v43_v7 = vld [vmem:[#allocation5 + $0x20] sm:$0xff]  ;;  %v44_v8 = vld [vmem:[#allocation5 + $0x28] sm:$0xff]  ;;  %v45_v9 = vld [vmem:[#allocation5 + $0x30] sm:$0xff]  ;;  %v472_v11 = vpack.c.bf16 %v42_v6, %v41_v4  ;;  %s334_s6 = sshll.u32 %s613_s1, 4  ;;  %s335_s6 = int_to_ptr.vmem [resolvable:$true] %s334_s6 }
  0x29   :  { %v46_v10 = vld [vmem:[#allocation5 + $0x38] sm:$0xff]  ;;  %v475_v12 = vpack.c.bf16 %v44_v8, %v43_v7  ;;  %v47_v14 = vld [vmem:[#allocation5 + $0x40] sm:$0xff]  ;;  %v48_v15 = vld [vmem:[#allocation5 + $0x48] sm:$0xff]  ;;  %s578_s7 = scalar_lea.vmem %s335_s6, 128  ;;  %p583_p3 = scmp.lt.s32.totalorder %s335_s6, %s335_s6 }
  0x2a   :  { %470 = vmatpush3.bf16.msra.mxu0 %v469_v5  ;;  %v478_v13 = vpack.c.bf16 %v46_v10, %v45_v9  ;;  %v38_v16 = vld [vmem:[#allocation2] sm:$0xff]  ;;  %v481_v17 = vpack.c.bf16 %v48_v15, %v47_v14  ;;  %v49_v18 = vld [vmem:[#allocation5 + $0x50] sm:$0xff]  ;;  %v51_v21 = vld [vmem:[#allocation5 + $0x60] sm:$0xff]  ;;  %p579_p2 = scmp.ne.s32.totalorder %s335_s6, %s578_s7  ;;  %p584_p4 = scmp.lt.s32.totalorder %s578_s7, %s578_s7 }
  0x2b   :  { %471 = vmatprep.subr.bf16.mxu0 %v610_v0  ;;  %476 = vmatpush3.bf16.msra.mxu1 %v475_v12  ;;  %v50_v19 = vld [vmem:[#allocation5 + $0x58] sm:$0xff]  ;;  %v52_v22 = vld [vmem:[#allocation5 + $0x68] sm:$0xff]  ;;  %v53_v24 = vld [vmem:[#allocation5 + $0x70] sm:$0xff] }
  0x2c   :  { %477 = vmatprep.subr.bf16.mxu1 %v610_v0  ;;  %v484_v20 = vpack.c.bf16 %v50_v19, %v49_v18  ;;  %v487_v23 = vpack.c.bf16 %v52_v22, %v51_v21  ;;  %v54_v25 = vld [vmem:[#allocation5 + $0x78] sm:$0xff]  ;;  %v55_v27 = vld [vmem:[#allocation5 + $0x80] sm:$0xff]  ;;  %v56_v28 = vld [vmem:[#allocation5 + $0x88] sm:$0xff]  ;;  %v323_v22 = vlaneseq  ;;  %p585_p5 = por %p584_p4, %p583_p3 }
  0x2d   :  { %v490_v26 = vpack.c.bf16 %v54_v25, %v53_v24  ;;  %v493_v29 = vpack.c.bf16 %v56_v28, %v55_v27  ;;  %v57_v30 = vld [vmem:[#allocation5 + $0x90] sm:$0xff]  ;;  %v58_v31 = vld [vmem:[#allocation5 + $0x98] sm:$0xff]  ;;  %v59_v33 = vld [vmem:[#allocation5 + $0xa0] sm:$0xff] }
  0x2e   :  { %473 = vmatpush3.bf16.msra.mxu0 %v472_v11  ;;  %v496_v32 = vpack.c.bf16 %v58_v31, %v57_v30  ;;  %v60_v34 = vld [vmem:[#allocation5 + $0xa8] sm:$0xff]  ;;  %v61_v35 = vld [vmem:[#allocation5 + $0xb0] sm:$0xff]  ;;  %v62_v37 = vld [vmem:[#allocation5 + $0xb8] sm:$0xff]  ;;  %p586_p6 = pnand %p585_p5, %p579_p2 }
  0x2f   :  { %498 = vmatprep.subr.bf16.mxu0 %v610_v0  ;;  %479 = vmatpush3.bf16.msra.mxu1 %v478_v13  ;;  %v499_v36 = vpack.c.bf16 %v60_v34, %v59_v33  ;;  %v502_v38 = vpack.c.bf16 %v62_v37, %v61_v35  ;;  %v63_v39 = vld [vmem:[#allocation5 + $0xc0] sm:$0xff]  ;;  %v64_v40 = vld [vmem:[#allocation5 + $0xc8] sm:$0xff]  ;;  %v65_v42 = vld [vmem:[#allocation5 + $0xd0] sm:$0xff] }
  0x30   :  { %480 = vmatprep.subr.bf16.mxu1 %v610_v0  ;;  %v505_v41 = vpack.c.bf16 %v64_v40, %v63_v39  ;;  %v66_v43 = vld [vmem:[#allocation5 + $0xd8] sm:$0xff]  ;;  %v67_v45 = vld [vmem:[#allocation5 + $0xe0] sm:$0xff]  ;;  %v68_v46 = vld [vmem:[#allocation5 + $0xe8] sm:$0xff] }
  0x31   :  { %396 = vmatmul.mubr.msk.f32.vlgmr.msra.gmra.mrb[0].mxu0 %vm82_vm1, %v38_v16  ;;  %v508_v44 = vpack.c.bf16 %v66_v43, %v65_v42  ;;  %v511_v47 = vpack.c.bf16 %v68_v46, %v67_v45  ;;  %v69_v48 = vld [vmem:[#allocation5 + $0xf0] sm:$0xff]  ;;  %v70_v49 = vld [vmem:[#allocation5 + $0xf8] sm:$0xff]  ;;  %v71_v51 = vld [vmem:[#allocation5 + $0x100] sm:$0xff] }
  0x32   :  { %465 = vmatprep.mubr.msk.f32.mxu0 %vm611_vm0, %v612_v1  ;;  %500 = vmatpush3.bf16.msra.mxu0 %v499_v36  ;;  %v514_v50 = vpack.c.bf16 %v70_v49, %v69_v48  ;;  %v72_v52 = vld [vmem:[#allocation5 + $0x108] sm:$0xff]  ;;  %v344_v54 = vld [vmem:[#allocation5 + $0x120] ss:$0 sm:$0xff]  ;;  %v73_v59 = vld [vmem:[#allocation5 + $0x110] sm:$0xff] }
  0x33   :  { %482 = vmatpush3.bf16.msra.mxu1 %v481_v17  ;;  %501 = vmatprep.subr.bf16.mxu0 %v610_v0  ;;  %v517_v53 = vpack.c.bf16 %v72_v52, %v71_v51  ;;  %v74_v60 = vld [vmem:[#allocation5 + $0x118] sm:$0xff]  ;;  %v346_v62 = vld [vmem:[#allocation5 + $0x121] ss:$0 sm:$0xff]  ;;  %v347_v4 = vld [vmem:[#allocation5 + $0x122] ss:$0 sm:$0xff] }
  0x34   :  { %483 = vmatprep.subr.bf16.mxu1 %v610_v0  ;;  %v520_v61 = vpack.c.bf16 %v74_v60, %v73_v59 }
  0x36   :  { %503 = vmatpush3.bf16.msra.mxu0 %v502_v38 }
  0x37   :  { %485 = vmatpush3.bf16.msra.mxu1 %v484_v20  ;;  %504 = vmatprep.subr.bf16.mxu0 %v610_v0 }
  0x38   :  { %486 = vmatprep.subr.bf16.mxu1 %v610_v0 }
  0x3a   :  { %506 = vmatpush3.bf16.msra.mxu0 %v505_v41 }
  0x3b   :  { %488 = vmatpush3.bf16.msra.mxu1 %v487_v23  ;;  %507 = vmatprep.subr.bf16.mxu0 %v610_v0  ;;  %v324_v23 = vand.u32 127, %v323_v22 }
  0x3c   :  { %489 = vmatprep.subr.bf16.mxu1 %v610_v0 }
  0x3d   :  { %vm325_vm2 = vcmp.lt.s32.totalorder %v324_v23, 4 }
  0x3e   :  { %509 = vmatpush3.bf16.msra.mxu0 %v508_v44 }
  0x3f   :  { %491 = vmatpush3.bf16.msra.mxu1 %v490_v26  ;;  %510 = vmatprep.subr.bf16.mxu0 %v610_v0 }
  0x40   :  { %492 = vmatprep.subr.bf16.mxu1 %v610_v0 }
  0x42   :  { %512 = vmatpush3.bf16.msra.mxu0 %v511_v47 }
  0x43   :  { %494 = vmatpush3.bf16.msra.mxu1 %v493_v29  ;;  %513 = vmatprep.subr.bf16.mxu0 %v610_v0 }
  0x44   :  { %495 = vmatprep.subr.bf16.mxu1 %v610_v0 }
  0x46   :  { %515 = vmatpush3.bf16.msra.mxu0 %v514_v50 }
  0x47   :  { %497 = vmatpush3.bf16.msra.mxu1 %v496_v32  ;;  %516 = vmatprep.subr.bf16.mxu0 %v610_v0 }
  0x4a   :  { %518 = vmatpush3.bf16.msra.mxu0 %v517_v53 }
  0x4b   :  { %519 = vmatprep.subr.bf16.mxu0 %v610_v0 }
  0x4e   :  { %521 = vmatpush3.bf16.msra.mxu0 %v520_v61 }
 0x104   :  { %v152_v55 = vpop.f32.mrb[0].mxu0 }
 0x105   :  { %v153_v56 = vadd.f32 %v344_v54, %v152_v55  ;;  %v397_v57 = vpop.f32.mrb[1].mxu0 }
 0x107   :  { %v156_v58 = vmax.f32 %v153_v56, 0.0 }
 0x109   :  { %431 = vmatmul.mubr.f32.vlgmr.msra.gmra.mrb[0].mxu1 %v156_v58 }
 0x1dc   :  { %v227_v63 = vpop.f32.mrb[0].mxu1 }
 0x1dd   :  { %v228_v1 = vadd.f32 %v346_v62, %v227_v63  ;;  %v432_v2 = vpop.f32.mrb[1].mxu1 }
 0x1df   :  { %v231_v3 = vmax.f32 %v228_v1, 0.0 }
 0x1e1   :  { %466 = vmatmul.mubr.f32.vlgmr.msra.gmra.mrb[2].mxu0 %v231_v3 }
 0x2b4   :  { %v302_v5 = vpop.f32.mrb[2].mxu0 }
 0x2b5   :  { %v303_v6 = vadd.f32 %v347_v4, %v302_v5  ;;  %v467_v0 = vpop.f32.mrb[3].mxu0 }
 0x2b7   :  { %v306_v7 = vrot.slane %v303_v6, 4 }
 0x2b9   :  { %v307_v8 = vmax.f32 %v303_v6, %v306_v7 }
 0x2bb   :  { %v308_v9 = vrot.slane %v307_v8, 2 }
 0x2bd   :  { %v309_v10 = vmax.f32 %v307_v8, %v308_v9 }
 0x2bf   :  { %v310_v11 = vrot.slane %v309_v10, 1 }
 0x2c1   :  { %v311_v12 = vmax.f32 %v309_v10, %v310_v11 }
 0x2c3   :  { %v312_v13 = vsub.f32 %v303_v6, %v311_v12 }
 0x2c5   :  { %v313_v14 = vmul.f32 1.442695, %v312_v13 }
 0x2c7   :  { %530 = vpow2.f32 %v313_v14 }
 0x2d1   :  { %v531_v15 = vpop.eup %530 }
 0x2d2   :  { %v315_v16 = vrot.slane %v531_v15, 4 }
 0x2d4   :  { %v316_v17 = vadd.f32 %v531_v15, %v315_v16 }
 0x2d6   :  { %v317_v18 = vrot.slane %v316_v17, 2 }
 0x2d8   :  { %v318_v19 = vadd.f32 %v317_v18, %v316_v17 }
 0x2da   :  { %v319_v20 = vrot.slane %v318_v19, 1 }
 0x2dc   :  { %v320_v21 = vadd.f32 %v319_v20, %v318_v19 }
 0x2de   :  { %532 = vrcp.f32 %v320_v21 }
 0x2e8   :  { %v533_v24 = vpop.eup %532 }
 0x2e9   :  { %v322_v25 = vmul.f32 %v533_v24, %v531_v15 }
 0x2eb   :  { %v326_v26 = vsel %vm325_vm2, %v322_v25, %v303_v6 }
 0x2ec   :  { %327 = vst [vmem:[#allocation7] sm:$0xff] %v326_v26 }
 0x2ed   :  { %589 = shalt.err (!%p586_p6)
}
 0x2ee   :  { %s590_s10 = scalar_lea.hbm %s695_s2, 128 }
 0x2ef   :  { %p591_p7 = scmp.ne.s32.totalorder %s695_s2, %s590_s10  ;;  %p594_p8 = scmp.lt.u32.totalorder %s590_s10, %s695_s2 }
 0x2f1   :  { %p596_p9 = pnand %p594_p8, %p591_p7 }
 0x2f3   :  { %599 = shalt.err (!%p596_p9)
}
 0x2f4   :  { %337 = dma.vmem_to_hbm [thread:$0]  %s335_s6, 128, %s695_s2, [#allocation4]  }
 0x2f5   :  { %604 = dma.done.wait [#allocation4], 128  }
 0x2f6   :  { %605 = vsyncadd [#allocation4], 4294967168 }
 0x2f7   :  { %341 = vsyncpa [#allocation3], 1 }
 0x2f8   :  { %342 = vsyncpa [#allocation6], 1 }
 0x2f9   :  { %343 = vsyncpa [#allocation4], 1 }

</bundles_post_ra>
